<compile_context>
chip_gen: v5e
topology: v5e:2x2
jax: 0.10.0
libtpu: 0.0.40
codegen_flags: <defaults>
</compile_context>

<pallas_src>
import functools
import math

import numpy as np

import jax
import jax.numpy as jnp
from jax.experimental import pallas as pl
from jax.experimental.pallas import tpu as pltpu


_VPU_CHANNEL_LIMIT = 32  # below this, 1x1 convs run as unrolled VPU MACs


# ---------------------------------------------------------------------------
# Kernels (one batch element per grid step; tiles are (C, H*W), HW on lanes).
# ---------------------------------------------------------------------------

def _matmul_1x1(w, x, cin, cout, hw):
    """y[o, p] = sum_i w[o, i] * x[i, p];  w: (Cout, Cin), x: (Cin, HW)."""
    if max(cin, cout) <= _VPU_CHANNEL_LIMIT:
        # Tiny channel counts: MXU would be ~idle while paying push/pop
        # latency; unroll the contraction on the VPU instead.
        y = jnp.zeros((cout, hw), jnp.float32)
        for i in range(cin):
            y = y + w[:, i:i + 1] * x[i:i + 1, :]
        return y
    return jax.lax.dot_general(w, x, (((1,), (0,)), ((), ())),
                               preferred_element_type=jnp.float32)


def _pw_kernel(*refs, n_x, has_res, relu, cin, cout, hw):
    """Fused pointwise block: [ReLU]( W @ (sum of inputs) + shift [+ res] ).

    refs = (x_0..x_{n_x-1}, w, shift, [res], out)
      x_i:   (1, Cin, HW)
      w:     (Cout, Cin)    1x1 conv weight with BN scale folded in
      shift: (Cout, 1)      folded BN shift
      res:   (1, Cout, HW)  optional residual added before ReLU
      out:   (1, Cout, HW)
    """
    o_ref = refs[-1]
    x = refs[0][0]
    for r in refs[1:n_x]:
        x = x + r[0]
    w_ref = refs[n_x]
    shift_ref = refs[n_x + 1]
    y = _matmul_1x1(w_ref[...], x, cin, cout, hw) + shift_ref[...]
    if has_res:
        y = y + refs[n_x + 2][0]
    if relu:
        y = jnp.maximum(y, 0.0)
    o_ref[0] = y.astype(o_ref.dtype)


def _dw_kernel(x_ref, w1_ref, wdw_ref, shift_ref, mask_ref, o_ref, *,
               C, H, W, K, P):
    """Fused DWBlock: 1x1 conv -> depthwise KxK (stride 1, pad K//2) -> BN -> ReLU.

    x_ref:     (1, C, HW)
    w1_ref:    (C, C)        1x1 conv weight (Cout, Cin)
    wdw_ref:   (K*K, C, 1)   depthwise weights, tap-major, BN scale folded in
    shift_ref: (C, 1)        folded BN shift
    mask_ref:  (K*K, 1, HW)  per-tap boundary masks (1 inside the image,
                             0 where the shifted read leaves the HxW image)
    o_ref:     (1, C, HW)
    """
    HW = H * W
    x = x_ref[0]                                # (C, HW)
    y = _matmul_1x1(w1_ref[...], x, C, C, HW)   # pointwise conv output

    # Depthwise conv: each tap = static lane-roll of the flattened spatial
    # axis + boundary mask.  No padded scratch, no zeroing, no sublane slices.
    acc = jnp.zeros((C, HW), jnp.float32)
    for dy in range(K):
        for dx in range(K):
            t = dy * K + dx
            off = (dy - P) * W + (dx - P)
            if off == 0:                         # center tap: mask is all-ones
                acc = acc + y * wdw_ref[t]
            else:
                shifted = pltpu.roll(y, (-off) % HW, 1)
                acc = acc + shifted * wdw_ref[t] * mask_ref[t]

    o_ref[0] = jnp.maximum(acc + shift_ref[...], 0.0).astype(o_ref.dtype)


# ---------------------------------------------------------------------------
# pallas_call wrappers
# ---------------------------------------------------------------------------

def _pointwise(xs, w_folded, shift, residual=None, relu=False):
    """xs: list of (N, Cin, HW); returns (N, Cout, HW)."""
    n, cin, hw = xs[0].shape
    cout = w_folded.shape[0]
    n_x = len(xs)
    has_res = residual is not None
    kernel = functools.partial(_pw_kernel, n_x=n_x, has_res=has_res, relu=relu,
                               cin=cin, cout=cout, hw=hw)
    in_specs = [pl.BlockSpec((1, cin, hw), lambda i: (i, 0, 0)) for _ in xs]
    in_specs += [pl.BlockSpec((cout, cin), lambda i: (0, 0)),
                 pl.BlockSpec((cout, 1), lambda i: (0, 0))]
    args = list(xs) + [w_folded, shift]
    if has_res:
        in_specs.append(pl.BlockSpec((1, cout, hw), lambda i: (i, 0, 0)))
        args.append(residual)
    return pl.pallas_call(
        kernel,
        out_shape=jax.ShapeDtypeStruct((n, cout, hw), xs[0].dtype),
        grid_spec=pltpu.PrefetchScalarGridSpec(
            num_scalar_prefetch=0,
            grid=(n,),
            in_specs=in_specs,
            out_specs=pl.BlockSpec((1, cout, hw), lambda i: (i, 0, 0)),
        ),
        compiler_params=pltpu.CompilerParams(
            dimension_semantics=("parallel",)),
    )(*args)


@functools.lru_cache(maxsize=None)
def _dw_masks(H, W, K):
    """Per-tap validity masks for a 'same' KxK depthwise conv, shape (K*K,1,HW)."""
    P = K // 2
    hh = np.arange(H)[:, None]
    ww = np.arange(W)[None, :]
    rows = []
    for dy in range(K):
        for dx in range(K):
            m = ((hh + dy - P >= 0) & (hh + dy - P < H) &
                 (ww + dx - P >= 0) & (ww + dx - P < W))
            rows.append(m.reshape(1, H * W))
    return jnp.asarray(np.stack(rows, 0).astype(np.float32))


def _run_dwblock(x, dwp, H, W, eps):
    n, c, hw = x.shape
    K = int(dwp["wdw"].shape[-1])
    P = K // 2
    scale = dwp["bn"]["gamma"] / jnp.sqrt(dwp["bn"]["var"] + eps)
    shift = (dwp["bn"]["beta"] - dwp["bn"]["mean"] * scale)[:, None]     # (C,1)
    w1 = dwp["w1"][:, :, 0, 0]                                           # (C,C)
    wdw = dwp["wdw"][:, 0, :, :] * scale[:, None, None]                  # (C,K,K)
    wdw = jnp.transpose(wdw, (1, 2, 0)).reshape(K * K, c, 1)             # tap-major
    masks = _dw_masks(H, W, K)
    kernel = functools.partial(_dw_kernel, C=c, H=H, W=W, K=K, P=P)
    return pl.pallas_call(
        kernel,
        out_shape=jax.ShapeDtypeStruct((n, c, hw), x.dtype),
        grid_spec=pltpu.PrefetchScalarGridSpec(
            num_scalar_prefetch=0,
            grid=(n,),
            in_specs=[
                pl.BlockSpec((1, c, hw), lambda i: (i, 0, 0)),
                pl.BlockSpec((c, c), lambda i: (0, 0)),
                pl.BlockSpec((K * K, c, 1), lambda i: (0, 0, 0)),
                pl.BlockSpec((c, 1), lambda i: (0, 0)),
                pl.BlockSpec((K * K, 1, hw), lambda i: (0, 0, 0)),
            ],
            out_specs=pl.BlockSpec((1, c, hw), lambda i: (i, 0, 0)),
        ),
        compiler_params=pltpu.CompilerParams(
            dimension_semantics=("parallel",)),
    )(x, w1, wdw, shift, masks)


# ---------------------------------------------------------------------------
# CBlock / CDBlock composition (inference-mode BN folded in the wrapper)
# ---------------------------------------------------------------------------

def _fold_conv_bn(cb, eps):
    scale = cb["bn"]["gamma"] / jnp.sqrt(cb["bn"]["var"] + eps)
    w = cb["w"][:, :, 0, 0] * scale[:, None]                      # (Cout, Cin)
    shift = (cb["bn"]["beta"] - cb["bn"]["mean"] * scale)[:, None]  # (Cout, 1)
    return w, shift


def _run_cblock(x, p, H, W, eps):
    w_sq, b_sq = _fold_conv_bn(p["squeeze"], eps)
    xs = _pointwise([x], w_sq, b_sq, relu=True)            # Conv1x1BNReLU (squeeze)
    r1 = xs
    for dp in p["conv1"]:
        r1 = _run_dwblock(r1, dp, H, W, eps)
    r2 = xs
    for dp in p["conv2"]:
        r2 = _run_dwblock(r2, dp, H, W, eps)
    # TODO(synk): AdaptiveFuse (adaptionfuse=True) branch not implemented.
    if p["expand"] is not None:
        w_e, b_e = _fold_conv_bn(p["expand"], eps)
        identity = _pointwise([x], w_e, b_e, relu=False)   # Conv1x1BN (expand)
    else:
        identity = x
    w_r, b_r = _fold_conv_bn(p["restore"], eps)
    # Fused: ReLU( restore(res1 + res2) + identity )
    return _pointwise([r1, r2], w_r, b_r, residual=identity, relu=True)


def cdblock_forward(x_nchw, params, eps=1e-5):
    n, c, H, W = x_nchw.shape
    x = x_nchw.reshape(n, c, H * W)   # free, contiguous reshape (stays NCHW)
    for p in params["blocks"]:
        x = _run_cblock(x, p, H, W, eps)
    return x.reshape(n, x.shape[1], H, W)


# ---------------------------------------------------------------------------
# Parameter initialization (matches the PyTorch module's shapes)
# ---------------------------------------------------------------------------

def _init_bn(key, c):
    kg, kb, km, kv = jax.random.split(key, 4)
    return {
        "gamma": jax.random.uniform(kg, (c,), jnp.float32, minval=0.5, maxval=1.5),
        "beta": jax.random.normal(kb, (c,), jnp.float32) * 0.1,
        "mean": jax.random.normal(km, (c,), jnp.float32) * 0.1,
        "var": jax.random.uniform(kv, (c,), jnp.float32, minval=0.5, maxval=1.5),
    }


def _init_conv_bn(key, cin, cout):
    kw, kb = jax.random.split(key)
    w = jax.random.normal(kw, (cout, cin, 1, 1), jnp.float32) / math.sqrt(cin)
    return {"w": w, "bn": _init_bn(kb, cout)}


def _init_dwblock(key, c, k=3):
    ka, kb, kc = jax.random.split(key, 3)
    return {
        "w1": jax.random.normal(ka, (c, c, 1, 1), jnp.float32) / math.sqrt(c),
        "wdw": jax.random.normal(kb, (c, 1, k, k), jnp.float32) / k,
        "bn": _init_bn(kc, c),
    }


def _init_cblock(key, cin, cout, k1, k2, reduction=4):
    mid = cout // reduction
    ks = jax.random.split(key, 5)
    n1, n2 = k1 // 2, k2 // 2
    return {
        "squeeze": _init_conv_bn(ks[0], cin, mid),
        "conv1": [_init_dwblock(kk, mid)
                  for kk in (jax.random.split(ks[1], n1) if n1 else [])],
        "conv2": [_init_dwblock(kk, mid)
                  for kk in (jax.random.split(ks[2], n2) if n2 else [])],
        "restore": _init_conv_bn(ks[3], mid, cout),
        "expand": _init_conv_bn(ks[4], cin, cout) if cin != cout else None,
    }


def init_cdblock_params(key, in_planes, out_planes, kernel_list):
    k1, k2, r = kernel_list
    keys = jax.random.split(key, r)
    blocks = [_init_cblock(keys[0], in_planes, out_planes, k1, k2)]
    for i in range(1, r):
        blocks.append(_init_cblock(keys[i], out_planes, out_planes, k1, k2))
    return {"blocks": blocks}


# ---------------------------------------------------------------------------
# Pure-JAX reference (eval-mode BN), mirrors the PyTorch forward
# ---------------------------------------------------------------------------

def _ref_conv1x1(x, w):
    return jax.lax.conv_general_dilated(
        x, w, window_strides=(1, 1), padding="VALID",
        dimension_numbers=("NCHW", "OIHW", "NCHW"))


def _ref_bn(x, bn, eps):
    scale = bn["gamma"] / jnp.sqrt(bn["var"] + eps)
    shift = bn["beta"] - bn["mean"] * scale
    return x * scale[None, :, None, None] + shift[None, :, None, None]


def _ref_dwblock(x, dp, eps):
    c = x.shape[1]
    k = dp["wdw"].shape[-1]
    p = k // 2
    y = _ref_conv1x1(x, dp["w1"])
    y = jax.lax.conv_general_dilated(
        y, dp["wdw"], window_strides=(1, 1), padding=[(p, p), (p, p)],
        dimension_numbers=("NCHW", "OIHW", "NCHW"), feature_group_count=c)
    return jnp.maximum(_ref_bn(y, dp["bn"], eps), 0.0)


def _ref_cblock(x, p, eps):
    xs = jnp.maximum(_ref_bn(_ref_conv1x1(x, p["squeeze"]["w"]),
                             p["squeeze"]["bn"], eps), 0.0)
    r1 = xs
    for dp in p["conv1"]:
        r1 = _ref_dwblock(r1, dp, eps)
    r2 = xs
    for dp in p["conv2"]:
        r2 = _ref_dwblock(r2, dp, eps)
    res = _ref_bn(_ref_conv1x1(r1 + r2, p["restore"]["w"]),
                  p["restore"]["bn"], eps)
    if p["expand"] is not None:
        identity = _ref_bn(_ref_conv1x1(x, p["expand"]["w"]),
                           p["expand"]["bn"], eps)
    else:
        identity = x
    return jnp.maximum(res + identity, 0.0)


def cdblock_reference(x, params, eps=1e-5):
    for p in params["blocks"]:
        x = _ref_cblock(x, p, eps)
    return x


if __name__ == "__main__":
    N, in_planes, out_planes = 2, 4, 16
    H = W = 16
    kernel_list = (3, 5, 2)   # (k1, k2, r): 1 & 2 DWBlocks per branch, 2 CBlocks

    key = jax.random.PRNGKey(0)
    kx, kp = jax.random.split(key)
    x = jax.random.normal(kx, (N, in_planes, H, W), dtype=jnp.float32)
    params = init_cdblock_params(kp, in_planes, out_planes, kernel_list)

    out = jax.block_until_ready(cdblock_forward(x, params))
    ref = jax.block_until_ready(cdblock_reference(x, params))

    assert out.shape == (N, out_planes, H, W), out.shape
    max_err = float(jnp.max(jnp.abs(out - ref)))
    assert jnp.allclose(out, ref, atol=1e-4, rtol=1e-4), max_err

    print("KERNEL_OK")
</pallas_src>

<mosaic_0001>
module attributes {stable_mosaic.version = 11 : i64} {
  func.func @_pw_kernel(%arg0: i32, %arg1: memref<1x4x256xf32, #tpu.memory_space<vmem>>, %arg2: memref<4x4xf32, #tpu.memory_space<vmem>>, %arg3: memref<4x1xf32, #tpu.memory_space<vmem>>, %arg4: memref<1x4x256xf32, #tpu.memory_space<vmem>>) attributes {dimension_semantics = [#tpu.dimension_semantics<parallel>], iteration_bounds = array<i64: 2>, scalar_prefetch = 0 : i64, scratch_operands = 0 : i64, tpu.core_type = #tpu.core_type<tc>, window_params = [{transform_indices = @transform_0, window_bounds = array<i64: 1, 4, 256>}, {pipeline_mode = #tpu.pipeline_mode<synchronous>, transform_indices = @transform_1, window_bounds = array<i64: 4, 4>}, {pipeline_mode = #tpu.pipeline_mode<synchronous>, transform_indices = @transform_2, window_bounds = array<i64: 4, 1>}, {transform_indices = @transform_3, window_bounds = array<i64: 1, 4, 256>}]} {
    %c0 = arith.constant 0 : index
    %c0_0 = arith.constant 0 : index
    %c0_1 = arith.constant 0 : index
    %0 = vector.load %arg1[%c0, %c0_0, %c0_1] : memref<1x4x256xf32, #tpu.memory_space<vmem>>, vector<1x4x256xf32>
    %1 = vector.shape_cast %0 : vector<1x4x256xf32> to vector<4x256xf32>
    %c0_2 = arith.constant 0 : index
    %c0_3 = arith.constant 0 : index
    %2 = vector.load %arg2[%c0_2, %c0_3] : memref<4x4xf32, #tpu.memory_space<vmem>>, vector<4x4xf32>
    %cst = arith.constant 0.000000e+00 : f32
    %3 = vector.broadcast %cst : f32 to vector<4x256xf32>
    %4 = vector.extract_strided_slice %2 {offsets = [0, 0], sizes = [4, 1], strides = [1, 1]} : vector<4x4xf32> to vector<4x1xf32>
    %5 = vector.extract_strided_slice %1 {offsets = [0, 0], sizes = [1, 256], strides = [1, 1]} : vector<4x256xf32> to vector<1x256xf32>
    %6 = vector.broadcast %4 : vector<4x1xf32> to vector<4x256xf32>
    %7 = vector.broadcast %5 : vector<1x256xf32> to vector<4x256xf32>
    %8 = arith.mulf %6, %7 : vector<4x256xf32>
    %9 = arith.addf %3, %8 : vector<4x256xf32>
    %10 = vector.extract_strided_slice %2 {offsets = [0, 1], sizes = [4, 1], strides = [1, 1]} : vector<4x4xf32> to vector<4x1xf32>
    %11 = vector.extract_strided_slice %1 {offsets = [1, 0], sizes = [1, 256], strides = [1, 1]} : vector<4x256xf32> to vector<1x256xf32>
    %12 = vector.broadcast %10 : vector<4x1xf32> to vector<4x256xf32>
    %13 = vector.broadcast %11 : vector<1x256xf32> to vector<4x256xf32>
    %14 = arith.mulf %12, %13 : vector<4x256xf32>
    %15 = arith.addf %9, %14 : vector<4x256xf32>
    %16 = vector.extract_strided_slice %2 {offsets = [0, 2], sizes = [4, 1], strides = [1, 1]} : vector<4x4xf32> to vector<4x1xf32>
    %17 = vector.extract_strided_slice %1 {offsets = [2, 0], sizes = [1, 256], strides = [1, 1]} : vector<4x256xf32> to vector<1x256xf32>
    %18 = vector.broadcast %16 : vector<4x1xf32> to vector<4x256xf32>
    %19 = vector.broadcast %17 : vector<1x256xf32> to vector<4x256xf32>
    %20 = arith.mulf %18, %19 : vector<4x256xf32>
    %21 = arith.addf %15, %20 : vector<4x256xf32>
    %22 = vector.extract_strided_slice %2 {offsets = [0, 3], sizes = [4, 1], strides = [1, 1]} : vector<4x4xf32> to vector<4x1xf32>
    %23 = vector.extract_strided_slice %1 {offsets = [3, 0], sizes = [1, 256], strides = [1, 1]} : vector<4x256xf32> to vector<1x256xf32>
    %24 = vector.broadcast %22 : vector<4x1xf32> to vector<4x256xf32>
    %25 = vector.broadcast %23 : vector<1x256xf32> to vector<4x256xf32>
    %26 = arith.mulf %24, %25 : vector<4x256xf32>
    %27 = arith.addf %21, %26 : vector<4x256xf32>
    %c0_4 = arith.constant 0 : index
    %c0_5 = arith.constant 0 : index
    %28 = vector.load %arg3[%c0_4, %c0_5] : memref<4x1xf32, #tpu.memory_space<vmem>>, vector<4x1xf32>
    %29 = vector.broadcast %28 : vector<4x1xf32> to vector<4x256xf32>
    %30 = arith.addf %27, %29 : vector<4x256xf32>
    %cst_6 = arith.constant 0.000000e+00 : f32
    %31 = vector.broadcast %cst_6 : f32 to vector<4x256xf32>
    %32 = arith.maximumf %30, %31 : vector<4x256xf32>
    %c0_7 = arith.constant 0 : index
    %c0_8 = arith.constant 0 : index
    %c0_9 = arith.constant 0 : index
    %33 = vector.load %arg4[%c0_7, %c0_8, %c0_9] : memref<1x4x256xf32, #tpu.memory_space<vmem>>, vector<1x4x256xf32>
    %34 = vector.shape_cast %33 : vector<1x4x256xf32> to vector<4x256xf32>
    %35 = vector.shape_cast %32 : vector<4x256xf32> to vector<1x4x256xf32>
    tpu.vector_store %arg4[%c0_7, %c0_8, %c0_9], %35 {strides = array<i32>} : memref<1x4x256xf32, #tpu.memory_space<vmem>>, vector<1x4x256xf32>,
    return
  }
  func.func @transform_0(%arg0: i32) -> (i32, i32, i32) {
    %c0_i32 = arith.constant 0 : i32
    %c0_i32_0 = arith.constant 0 : i32
    %c0_i32_1 = arith.constant 0 : i32
    return %arg0, %c0_i32, %c0_i32_0 : i32, i32, i32
  }
  func.func @transform_1(%arg0: i32) -> (i32, i32) {
    %c0_i32 = arith.constant 0 : i32
    %c0_i32_0 = arith.constant 0 : i32
    %c0_i32_1 = arith.constant 0 : i32
    return %c0_i32, %c0_i32_0 : i32, i32
  }
  func.func @transform_2(%arg0: i32) -> (i32, i32) {
    %c0_i32 = arith.constant 0 : i32
    %c0_i32_0 = arith.constant 0 : i32
    %c0_i32_1 = arith.constant 0 : i32
    return %c0_i32, %c0_i32_0 : i32, i32
  }
  func.func @transform_3(%arg0: i32) -> (i32, i32, i32) {
    %c0_i32 = arith.constant 0 : i32
    %c0_i32_0 = arith.constant 0 : i32
    %c0_i32_1 = arith.constant 0 : i32
    return %arg0, %c0_i32, %c0_i32_0 : i32, i32, i32
  }
}

</mosaic_0001>

<bundles_post_ra>
// kernel: tpu_custom_call.1
= control target key start
LH: loop header
LB: loop body
LE: loop exit
PB: predicated region body
PF: predicated region fallthrough
CT: control target
= control target key end

     0   :  { %8 = vsyncpa [#allocation3], 0  ;;  %s684_s0 = inlined_call_operand.hbm [shape: f32[2,4,256], index: 0, kind: input, shape index: {}]   ;;  %s685_s1 = inlined_call_operand.vmem [shape: f32[4,4], index: 1, kind: input, shape index: {}]   ;;  %s686_s2 = inlined_call_operand.vmem [shape: f32[4,1], index: 2, kind: input, shape index: {}]   ;;  %s687_s3 = inlined_call_operand.hbm [shape: f32[2,4,256], index: 3, kind: output, shape index: {}]  }
   0x1   :  { %10 = vsyncpa [#allocation3 + $0x1], 0 }
   0x2   :  { %11 = vsyncpa [#allocation4], 0 }
   0x3   :  { %13 = vsyncpa [#allocation4 + $0x1], 0  ;;  %s547_s12 = smov 0   ;;  %s549_s13 = smov 0  }
   0x4   :  { %s551_s14 = smov 0   ;;  %s553_s15 = smov 0  }
   0x5 LB: > { %s568_s16 = sadd.s32 4294967295, %s521_s15   ;;  %s353_s17 = sadd.s32 4294967294, %s521_s15   ;;  %s521_s15 = sphi %s553_s15, %s697_s15   ;;  %s517_s14 = sphi %s551_s14, %s696_s14   ;;  %s513_s13 = sphi %s549_s13, %s695_s13   ;;  %s509_s12 = sphi %s547_s12, %s694_s12  }
   0x6   : > { %s572_s18 = sadd.s32 1, %s521_s15   ;;  %s26_s19 = sadd.s32 1, %s517_s14 }
   0x7   : > { %s23_s20 = ssub.s32 %s521_s15, %s572_s18  ;;  %p33_p0 = scmp.ne.s32.totalorder %s517_s14, %s513_s13 }
   0x8   : > { %p24_p1 = scmp.eq.s32.totalorder %s23_s20, 0  ;;  %p34_p2 = scmp.eq.s32.totalorder %s521_s15, 0 }
   0x9   : > { %p39_p3 = scmp.ne.s32.totalorder %s513_s13, %s509_s12  ;;  %p40_p4 = scmp.eq.s32.totalorder %s568_s16, 0 }
   0xa   : > { %s584_s21 = scalar_select %p24_p1, %s517_s14, %s26_s19  }
   0xb   : > { %p586_p5 = por %p34_p2, %p33_p0  ;;  %p590_p6 = por %p40_p4, %p39_p3 }
   0xc   : > { %p105_p7 = scmp.eq.s32.totalorder %s568_s16, 1  ;;  %p111_p8 = scmp.eq.s32.totalorder %s353_s17, 1 }
   0xd   : > { %p381_p10 = scmp.lt.s32.totalorder %s521_s15, 2  ;;  %s137_s26 = sand.u32 1, %s517_s14  }
   0xe   : > { %p597_p11 = por %p105_p7, %p33_p0  ;;  %p601_p12 = por %p111_p8, %p39_p3 }
   0xf   : > { %s367_s27 = sshll.u32 %s521_s15, 3  ;;  %s356_s28 = sshll.u32 %s137_s26, 3 }
  0x10   : > { %s146_s4 = scalar_lea.hbm %s684_s0, %s367_s27  ;;  %s141_s6 = scalar_lea.vmem [#allocation2], %s356_s28 }
  0x11   : > { %s148_s5 = sshll.u32 %s146_s4, 4  ;;  %s150_s7 = sshll.u32 %s141_s6, 4  ;;  %s149_s5 = int_to_ptr.hbm [resolvable:$true] %s148_s5  ;;  %s151_s7 = int_to_ptr.vmem [resolvable:$true] %s150_s7 }
  0x12   : > { %p612_p13 = pnand %p381_p10, %p586_p5  ;;  %p359_p0 = scmp.ge.s32.totalorder %s521_s15, 1 }
  0x13   : > { %p155_p1 = scmp.lt.s32.totalorder %s521_s15, 3  ;;  %s138_s9 = scalar_lea.sflag [#allocation3], %s137_s26 }
  0x14   : > { %s425_s10 = sshra.s32 %s149_s5, 4  ;;  %p429_p3 = pneg %p612_p13  ;;  %s426_s10 = int_to_ptr.hbm [resolvable:$true] %s425_s10 }
  0x15   : > { %s427_s11 = scalar_lea.hbm %s426_s10, 8  ;;  %s432_s20 = scalar_lea.hbm %s684_s0, 16 }
  0x16   : > { %p428_p2 = scmp.ne.s32.totalorder %s426_s10, %s427_s11  ;;  %p433_p5 = scmp.lt.s32.totalorder %s426_s10, %s684_s0 }
  0x17   : > { %p434_p8 = scmp.lt.s32.totalorder %s432_s20, %s427_s11 }
  0x18   : > { %p430_p4 = pnand %p429_p3, %p428_p2 }
  0x19   : > { %p435_p10 = por %p434_p8, %p433_p5 }
  0x1a   : > { %p431_p7 = pneg %p430_p4 }
  0x1c   : > { %p436_p9 = pnand %p435_p10, %p431_p7 }
  0x1e   : > { %439 = shalt.err (!%p436_p9)
}
  0x1f   : > { %376 = dma.hbm_to_vmem [thread:$0]  (!%p612_p13), %s149_s5, 128, %s151_s7, %s138_s9  }
  0x20   : > { %p156_p2 = pnand %p359_p0, %p155_p1 }
  0x21   : > { %s633_s26 = sand.u32 (!%p156_p2), 1, %s513_s13  }
  0x22   : > { %159 = sbr.rel (%p156_p2) target bundleno = 184 (0xb8), region = 32  ;;  %s360_s28 = sshll.u32 (!%p156_p2), %s633_s26, 3 }
  0x23   : > { %s162_s29 = scalar_lea.sflag (!%p156_p2), [#allocation3], %s633_s26  ;;  %s165_s30 = scalar_lea.vmem (!%p156_p2), [#allocation2], %s360_s28 }
  0x27   : > { %500 = dma.done.wait (%p590_p6), %s162_s29, 128  }
  0x28   : > { %502 = vsyncadd (%p590_p6), %s162_s29, 4294967168  ;;  %v523_v0 = vmov 0   ;;  %v524_v1 = vmov 2   ;;  %v190_v2 = vld [vmem:[%s685_s1] sm:$0xf]  ;;  %v525_v4 = vmov 1  }
  0x29   : > { %419 = vset.pattern.permute.xlu0 %v523_v0  ;;  %421 = vset.pattern.permute.xlu1 %v524_v1  ;;  %v249_v3 = vld [vmem:[%s686_s2] sm:$0xf]  ;;  %v526_v5 = vmov 3   ;;  %s368_s23 = sshll.u32 %s568_s16, 3  ;;  %s188_s11 = scalar_lea.vmem [#allocation5], %s360_s28  ;;  %vm262_vm0 = vcmask 1043456  }
  0x2a   : > { %423 = vset.pattern.permute.xlu2 %v523_v0  ;;  %193 = vperm.xlu0 %419, %v190_v2   ;;  %v189_v6 = vld [vmem:[%s165_s30] sm:$0xff]  ;;  %s278_s10 = scalar_lea.hbm %s687_s3, %s368_s23  ;;  %s280_s17 = sshll.u32 %s188_s11, 4  ;;  %s281_s17 = int_to_ptr.vmem [resolvable:$true] %s280_s17 }
  0x2b   : > { %222 = vperm.xlu1 %421, %v190_v2   ;;  %252 = vperm.xlu2 %423, %v249_v3   ;;  %v197_v9 = vperm.slane %v189_v6, 0  ;;  %v198_v10 = vperm.slane %v189_v6, 4  ;;  %v211_v11 = vperm.slane %v189_v6, 1  ;;  %v212_v12 = vperm.slane %v189_v6, 5  ;;  %s282_s19 = sshll.u32 %s278_s10, 4  ;;  %s267_s16 = scalar_lea.sflag [#allocation4], %s633_s26  ;;  %s283_s19 = int_to_ptr.hbm [resolvable:$true] %s282_s19 }
  0x2c   : > { %v225_v13 = vperm.slane %v189_v6, 2  ;;  %v226_v14 = vperm.slane %v189_v6, 6  ;;  %v239_v15 = vperm.slane %v189_v6, 3  ;;  %v240_v16 = vperm.slane %v189_v6, 7  ;;  %s469_s20 = sshra.s32 %s283_s19, 4  ;;  %s475_s28 = scalar_lea.hbm %s687_s3, 16  ;;  %s470_s20 = int_to_ptr.hbm [resolvable:$true] %s469_s20 }
  0x2d   : > { %v201_v17 = vperm.slane %v197_v9, 0  ;;  %v202_v18 = vperm.slane %v198_v10, 0  ;;  %v215_v19 = vperm.slane %v211_v11, 1  ;;  %v216_v20 = vperm.slane %v212_v12, 1  ;;  %s471_s22 = scalar_lea.hbm %s470_s20, 8  ;;  %p476_p0 = scmp.lt.s32.totalorder %s470_s20, %s687_s3 }
  0x2e   : > { %v229_v21 = vperm.slane %v225_v13, 2  ;;  %v230_v22 = vperm.slane %v226_v14, 2  ;;  %v243_v23 = vperm.slane %v239_v15, 3  ;;  %v244_v24 = vperm.slane %v240_v16, 3  ;;  %p472_p6 = scmp.ne.s32.totalorder %s470_s20, %s471_s22  ;;  %p477_p1 = scmp.lt.s32.totalorder %s475_s28, %s471_s22 }
  0x30   : > { %p473_p9 = pnand %p472_p6, %p597_p11  ;;  %p478_p3 = por %p477_p1, %p476_p0 }
  0x32   : > { %420 = vset.pattern.permute.xlu0 %v525_v4  ;;  %p474_p13 = pneg %p473_p9 }
  0x33   : > { %422 = vset.pattern.permute.xlu1 %v526_v5  ;;  %208 = vperm.xlu0 %420, %v190_v2  }
  0x34   : > { %236 = vperm.xlu1 %422, %v190_v2   ;;  %p479_p4 = pnand %p478_p3, %p474_p13 }
  0x3b   : > { %424 = vset.pattern.permute.xlu0 %v523_v0 }
  0x85   : > { %v253_v39 = vpop.permute.xlu2 %252 }
  0x9c   : > { %v194_v7 = vpop.permute.xlu0 %193 }
  0x9d   : > { %v223_v8 = vpop.permute.xlu1 %222  ;;  %v203_v27 = vmul.f32 %v201_v17, %v194_v7  ;;  %v204_v28 = vmul.f32 %v202_v18, %v194_v7 }
  0x9e   : > { %v231_v31 = vmul.f32 %v229_v21, %v223_v8  ;;  %v232_v32 = vmul.f32 %v230_v22, %v223_v8 }
  0xa5   : > { %v209_v25 = vpop.permute.xlu0 %208 }
  0xa6   : > { %v237_v26 = vpop.permute.xlu1 %236  ;;  %v217_v29 = vmul.f32 %v215_v19, %v209_v25  ;;  %v218_v30 = vmul.f32 %v216_v20, %v209_v25 }
  0xa7   : > { %v245_v35 = vmul.f32 %v243_v23, %v237_v26  ;;  %v246_v36 = vmul.f32 %v244_v24, %v237_v26 }
  0xa8   : > { %v219_v33 = vadd.f32 %v217_v29, %v203_v27  ;;  %v220_v34 = vadd.f32 %v218_v30, %v204_v28 }
  0xaa   : > { %v233_v37 = vadd.f32 %v231_v31, %v219_v33  ;;  %v234_v38 = vadd.f32 %v232_v32, %v220_v34 }
  0xac   : > { %v247_v40 = vadd.f32 %v245_v35, %v233_v37  ;;  %v248_v41 = vadd.f32 %v246_v36, %v234_v38 }
  0xae   : > { %v255_v42 = vadd.f32 %v253_v39, %v247_v40  ;;  %v256_v43 = vadd.f32 %v253_v39, %v248_v41 }
  0xb0   : > { %v258_v44 = vmax.f32 %v256_v43, 0.0  ;;  %v257_v45 = vmax.f32 %v255_v42, 0.0 }
  0xb2   : > { %v261_v46 = vrot.slane %v258_v44, 4 }
  0xb4   : > { %v263_v47 = vsel %vm262_vm0, %v257_v45, %v261_v46 }
  0xb5   : > { %265 = vst [vmem:[%s188_s11] sm:$0xff] %v263_v47 }
  0xb6   : > { %482 = shalt.err (!%p479_p4)
}
  0xb7   : > { %371 = dma.vmem_to_hbm [thread:$0]  (%p597_p11), %s281_s17, 128, %s283_s19, %s267_s16  }
  0xb8 PF: > { %s294_s26 = sand.u32 1, %s509_s12   ;;  %p693_p7 = scmp.ge.s32.totalorder %s521_s15, 2 }
  0xb9   : > { %s295_s5 = scalar_lea.sflag [#allocation4], %s294_s26 }
  0xba   : > { %p378_p5 = pnand %p693_p7, %p601_p12 }
  0xbc   : > { %p379_p8 = pneg %p378_p5 }
  0xbe   : > { %504 = dma.done.wait (%p379_p8), %s295_s5, 128  }
  0xbf   : > { %506 = vsyncadd (%p379_p8), %s295_s5, 4294967168  ;;  %p16_p10 = scmp.ge.s32.totalorder %s572_s18, 4   ;;  %s694_s12 = smov %s513_s13 }
  0xc0   : > { %s695_s13 = smov %s517_s14  ;;  %s696_s14 = smov %s584_s21 }
  0xc1   : > { %s697_s15 = smov %s572_s18  ;;  %18 = sbr.rel (!%p16_p10) target bundleno = 5 (0x5), region = 77 }
  0xc6   :  { %301 = vsyncpa [#allocation3], 1 }
  0xc7   :  { %303 = vsyncpa [#allocation3 + $0x1], 1 }
  0xc8   :  { %304 = vsyncpa [#allocation4], 1 }
  0xc9   :  { %306 = vsyncpa [#allocation4 + $0x1], 1 }

</bundles_post_ra>
